<compile_context>
chip_gen: v7x
topology: tpu7x:2x2x1
jax: 0.10.0
libtpu: 0.0.40
codegen_flags: <defaults>
</compile_context>

<pallas_src>
import functools

import jax
import jax.numpy as jnp
from jax.experimental import pallas as pl
from jax.experimental.pallas import tpu as pltpu


def _round_up(a: int, b: int) -> int:
    return ((a + b - 1) // b) * b


# ----------------------------- kernels --------------------------------------


def ffn_direct_kernel(x_ref, w1_ref, b1_ref, w2_ref, b2_ref, o_ref):
    """Whole d_ff resident: no reduction axis, no scratch, direct store."""
    xb = x_ref[...].astype(jnp.bfloat16)
    h = jnp.dot(xb, w1_ref[...], preferred_element_type=jnp.float32)
    h = jnp.maximum(h + b1_ref[...], 0.0)                 # f32 bias + ReLU epilogue
    y = jnp.dot(h.astype(jnp.bfloat16), w2_ref[...],
                preferred_element_type=jnp.float32)
    o_ref[...] = (y + b2_ref[...]).astype(o_ref.dtype)


def ffn_streaming_kernel(x_ref, w1_ref, b1_ref, w2_ref, b2_ref, o_ref, acc_ref):
    """d_ff streamed in chunks; f32 accumulator seeded with b2."""
    kff = pl.program_id(1)

    @pl.when(kff == 0)
    def _init():
        acc_ref[...] = jnp.broadcast_to(b2_ref[...], acc_ref.shape)

    xb = x_ref[...].astype(jnp.bfloat16)
    h = jnp.dot(xb, w1_ref[...], preferred_element_type=jnp.float32)
    h = jnp.maximum(h + b1_ref[...], 0.0)
    acc_ref[...] += jnp.dot(h.astype(jnp.bfloat16), w2_ref[...],
                            preferred_element_type=jnp.float32)

    @pl.when(kff == pl.num_programs(1) - 1)
    def _finalize():
        o_ref[...] = acc_ref[...].astype(o_ref.dtype)


# -------------------------- VMEM budgeting ----------------------------------

_VMEM_BUDGET = 36 * 1024 * 1024      # conservative vs v7x's 64 MiB physical VMEM
_VMEM_LIMIT = 48 * 1024 * 1024


def _direct_vmem(tm, d_model, d_ff, x_bytes, out_bytes):
    return (2 * 2 * d_model * d_ff * 2            # W1+W2 bf16 (pipeline buffers)
            + 2 * (d_ff + d_model) * 4            # biases f32
            + 2 * tm * d_model * x_bytes          # x blocks (double-buffered)
            + tm * d_model * 2                    # in-kernel bf16 copy of x tile
            + 2 * tm * d_model * out_bytes        # output blocks
            + tm * d_ff * (4 + 2))                # h f32 + bf16 copy


def _stream_vmem(tm, tff, d_model, x_bytes, out_bytes):
    return (2 * 2 * d_model * tff * 2             # W1/W2 chunks bf16, double-buffered
            + 2 * (tff + d_model) * 4             # bias chunks f32
            + 2 * tm * d_model * x_bytes
            + tm * d_model * 2
            + 2 * tm * d_model * out_bytes
            + tm * d_model * 4                    # f32 accumulator scratch
            + tm * tff * (4 + 2))                 # h f32 + bf16 copy


# ----------------------------- wrapper ---------------------------------------


@functools.partial(jax.jit,
                   static_argnames=("force_streaming", "tm_target", "tff_target"))
def feed_forward(x, w1, b1, w2, b2, *,
                 force_streaming=False, tm_target=None, tff_target=None):
    """x: (B, S, d_model); w1: (d_model, d_ff); w2: (d_ff, d_model).

    Weights are (in_features, out_features), i.e. transposed w.r.t.
    nn.Linear's (out, in) storage.
    """
    B, S, d_model = x.shape
    d_ff = w1.shape[1]
    out_dtype = x.dtype
    x_bytes = jnp.dtype(x.dtype).itemsize
    out_bytes = jnp.dtype(out_dtype).itemsize
    M = B * S

    x2 = x.reshape(M, d_model)

    # ---------------- DIRECT path: full weights resident in VMEM -------------
    use_direct = False
    if not force_streaming:
        tm = min(tm_target or 256, _round_up(M, 8))
        while tm > 8 and _direct_vmem(tm, d_model, d_ff, x_bytes, out_bytes) > _VMEM_BUDGET:
            tm = max(8, _round_up(tm // 2, 8))
        use_direct = _direct_vmem(tm, d_model, d_ff, x_bytes, out_bytes) <= _VMEM_BUDGET

    if use_direct:
        m_pad = _round_up(M, tm)
        # v7x megacore: make sure the single parallel axis has >= 2 row tiles.
        if m_pad // tm == 1 and m_pad >= 16:
            tm = _round_up((m_pad + 1) // 2, 8)
            m_pad = _round_up(M, tm)
        if m_pad != M:
            x2 = jnp.pad(x2, ((0, m_pad - M), (0, 0)))
        n_row_tiles = m_pad // tm

        # NOTE: in a real deployment these casts happen once at param-prep time.
        w1b = w1.astype(jnp.bfloat16)
        w2b = w2.astype(jnp.bfloat16)
        b1r = b1.reshape(1, d_ff).astype(jnp.float32)
        b2r = b2.reshape(1, d_model).astype(jnp.float32)

        flops = 4 * M * d_model * d_ff
        bytes_accessed = int(x2.size * x_bytes + w1b.size * 2 + w2b.size * 2
                             + b1r.size * 4 + b2r.size * 4
                             + m_pad * d_model * out_bytes)

        out2 = pl.pallas_call(
            ffn_direct_kernel,
            out_shape=jax.ShapeDtypeStruct((m_pad, d_model), out_dtype),
            grid_spec=pltpu.PrefetchScalarGridSpec(
                num_scalar_prefetch=0,
                grid=(n_row_tiles,),
                in_specs=[
                    pl.BlockSpec((tm, d_model), lambda i: (i, 0)),      # x rows
                    pl.BlockSpec((d_model, d_ff), lambda i: (0, 0)),    # W1 (resident)
                    pl.BlockSpec((1, d_ff), lambda i: (0, 0)),          # b1
                    pl.BlockSpec((d_ff, d_model), lambda i: (0, 0)),    # W2 (resident)
                    pl.BlockSpec((1, d_model), lambda i: (0, 0)),       # b2
                ],
                out_specs=pl.BlockSpec((tm, d_model), lambda i: (i, 0)),
            ),
            compiler_params=pltpu.CompilerParams(
                dimension_semantics=("parallel",),
                vmem_limit_bytes=_VMEM_LIMIT),
            cost_estimate=pl.CostEstimate(
                flops=flops, transcendentals=0, bytes_accessed=bytes_accessed),
        )(x2, w1b, b1r, w2b, b2r)
        return out2[:M].reshape(B, S, d_model)

    # -------------- STREAMING path: d_ff chunked, f32 accumulator ------------
    d_ff_pad128 = _round_up(d_ff, 128)
    tff_goal = tff_target or 2048
    divisors = [d for d in range(128, d_ff_pad128 + 1, 128) if d_ff_pad128 % d == 0]
    fits = [d for d in divisors if d <= tff_goal]
    tff = max(fits) if fits else min(divisors)

    # Row tile large enough to be MXU-bound (per-generation roofline), shrunk
    # to respect the VMEM budget (the (tm, tff) f32+bf16 intermediate dominates).
    tm = min(tm_target or 1024, _round_up(M, 8))
    while _stream_vmem(tm, tff, d_model, x_bytes, out_bytes) > _VMEM_BUDGET and tm > 256:
        tm = max(256, _round_up(tm // 2, 8))
    while _stream_vmem(tm, tff, d_model, x_bytes, out_bytes) > _VMEM_BUDGET and tff > 128:
        smaller = [d for d in divisors if d < tff]
        if not smaller:
            break
        tff = max(smaller)
    while _stream_vmem(tm, tff, d_model, x_bytes, out_bytes) > _VMEM_BUDGET and tm > 8:
        tm = max(8, _round_up(tm // 2, 8))

    d_ff_pad = _round_up(d_ff, tff)     # tff divides round_up(d_ff, 128)
    m_pad = _round_up(M, tm)
    if m_pad != M:
        x2 = jnp.pad(x2, ((0, m_pad - M), (0, 0)))

    w1b = w1.astype(jnp.bfloat16)
    w2b = w2.astype(jnp.bfloat16)
    b1r = b1.reshape(1, d_ff).astype(jnp.float32)
    if d_ff_pad != d_ff:
        # Zero columns contribute relu(0 + 0) @ 0 == 0 -> semantics unchanged.
        w1b = jnp.pad(w1b, ((0, 0), (0, d_ff_pad - d_ff)))
        w2b = jnp.pad(w2b, ((0, d_ff_pad - d_ff), (0, 0)))
        b1r = jnp.pad(b1r, ((0, 0), (0, d_ff_pad - d_ff)))
    b2r = b2.reshape(1, d_model).astype(jnp.float32)

    n_row_tiles = m_pad // tm
    n_ff_chunks = d_ff_pad // tff

    flops = 4 * M * d_model * d_ff
    bytes_accessed = int(
        x2.size * x_bytes
        + n_row_tiles * (w1b.size * 2 + w2b.size * 2 + b1r.size * 4)
        + b2r.size * 4
        + m_pad * d_model * out_bytes)

    out2 = pl.pallas_call(
        ffn_streaming_kernel,
        out_shape=jax.ShapeDtypeStruct((m_pad, d_model), out_dtype),
        grid_spec=pltpu.PrefetchScalarGridSpec(
            num_scalar_prefetch=0,
            grid=(n_row_tiles, n_ff_chunks),
            in_specs=[
                pl.BlockSpec((tm, d_model), lambda i, k: (i, 0)),   # x rows
                pl.BlockSpec((d_model, tff), lambda i, k: (0, k)),  # W1 chunk
                pl.BlockSpec((1, tff), lambda i, k: (0, k)),        # b1 chunk
                pl.BlockSpec((tff, d_model), lambda i, k: (k, 0)),  # W2 chunk
                pl.BlockSpec((1, d_model), lambda i, k: (0, 0)),    # b2
            ],
            out_specs=pl.BlockSpec((tm, d_model), lambda i, k: (i, 0)),
            scratch_shapes=[pltpu.VMEM((tm, d_model), jnp.float32)],
        ),
        compiler_params=pltpu.CompilerParams(
            dimension_semantics=("parallel", "arbitrary"),
            vmem_limit_bytes=_VMEM_LIMIT),
        cost_estimate=pl.CostEstimate(
            flops=flops, transcendentals=0, bytes_accessed=bytes_accessed),
    )(x2, w1b, b1r, w2b, b2r)

    return out2[:M].reshape(B, S, d_model)


# ------------------------------ checks ---------------------------------------


def _check(B, S, d_model, d_ff, key, **kw):
    kx, kw1, kb1, kw2, kb2 = jax.random.split(key, 5)
    x = jax.random.normal(kx, (B, S, d_model), dtype=jnp.float32)

    # nn.Linear-style init (uniform +-1/sqrt(fan_in)), stored as (in, out).
    lim1 = 1.0 / jnp.sqrt(jnp.float32(d_model))
    lim2 = 1.0 / jnp.sqrt(jnp.float32(d_ff))
    w1 = jax.random.uniform(kw1, (d_model, d_ff), jnp.float32, -lim1, lim1)
    b1 = jax.random.uniform(kb1, (d_ff,), jnp.float32, -lim1, lim1)
    w2 = jax.random.uniform(kw2, (d_ff, d_model), jnp.float32, -lim2, lim2)
    b2 = jax.random.uniform(kb2, (d_model,), jnp.float32, -lim2, lim2)

    out = jax.block_until_ready(feed_forward(x, w1, b1, w2, b2, **kw))
    assert out.shape == (B, S, d_model)

    # bf16-operand reference (same MXU precision as the kernel).
    xb = x.reshape(B * S, d_model).astype(jnp.bfloat16)
    h = jnp.maximum(
        jnp.dot(xb, w1.astype(jnp.bfloat16), preferred_element_type=jnp.float32)
        + b1, 0.0)
    ref_bf = (jnp.dot(h.astype(jnp.bfloat16), w2.astype(jnp.bfloat16),
                      preferred_element_type=jnp.float32)
              + b2).reshape(B, S, d_model)
    assert jnp.allclose(out, ref_bf, atol=5e-3, rtol=5e-3)

    # Full-precision module reference (loose tolerance for bf16 operands).
    ref_f32 = jnp.maximum(x @ w1 + b1, 0.0) @ w2 + b2
    assert jnp.allclose(out, ref_f32, atol=5e-2, rtol=5e-2)


if __name__ == "__main__":
    key = jax.random.PRNGKey(0)
    k1, k2, k3 = jax.random.split(key, 3)
    # Module-default shapes (d_model=128, d_ff=1024) -> resident-weights path.
    _check(B=2, S=8, d_model=128, d_ff=1024, key=k1)
    # Ragged row count (B*S not a multiple of 8) to exercise tail padding.
    _check(B=3, S=7, d_model=128, d_ff=1024, key=k2)
    # Force the d_ff-streaming / accumulator path (4 chunks) for coverage.
    _check(B=2, S=8, d_model=128, d_ff=1024, key=k3,
           force_streaming=True, tff_target=256)
    print("KERNEL_OK")
</pallas_src>

<mosaic_0001>
module attributes {stable_mosaic.version = 11 : i64} {
  func.func @ffn_direct_kernel(%arg0: i32, %arg1: memref<8x128xf32, #tpu.memory_space<vmem>>, %arg2: memref<128x1024xbf16, #tpu.memory_space<vmem>>, %arg3: memref<1x1024xf32, #tpu.memory_space<vmem>>, %arg4: memref<1024x128xbf16, #tpu.memory_space<vmem>>, %arg5: memref<1x128xf32, #tpu.memory_space<vmem>>, %arg6: memref<8x128xf32, #tpu.memory_space<vmem>>) attributes {dimension_semantics = [#tpu.dimension_semantics<parallel>], iteration_bounds = array<i64: 2>, scalar_prefetch = 0 : i64, scratch_operands = 0 : i64, tpu.core_type = #tpu.core_type<tc>, window_params = [{transform_indices = @transform_0, window_bounds = array<i64: 8, 128>}, {pipeline_mode = #tpu.pipeline_mode<synchronous>, transform_indices = @transform_1, window_bounds = array<i64: 128, 1024>}, {pipeline_mode = #tpu.pipeline_mode<synchronous>, transform_indices = @transform_2, window_bounds = array<i64: 1, 1024>}, {pipeline_mode = #tpu.pipeline_mode<synchronous>, transform_indices = @transform_3, window_bounds = array<i64: 1024, 128>}, {pipeline_mode = #tpu.pipeline_mode<synchronous>, transform_indices = @transform_4, window_bounds = array<i64: 1, 128>}, {transform_indices = @transform_5, window_bounds = array<i64: 8, 128>}]} {
    %c0 = arith.constant 0 : index
    %c0_0 = arith.constant 0 : index
    %0 = vector.load %arg1[%c0, %c0_0] : memref<8x128xf32, #tpu.memory_space<vmem>>, vector<8x128xf32>
    %1 = arith.truncf %0 : vector<8x128xf32> to vector<8x128xbf16>
    %c0_1 = arith.constant 0 : index
    %c0_2 = arith.constant 0 : index
    %2 = vector.load %arg2[%c0_1, %c0_2] : memref<128x1024xbf16, #tpu.memory_space<vmem>>, vector<128x1024xbf16>
    %cst = arith.constant dense<0.000000e+00> : vector<8x1024xf32>
    %3 = tpu.matmul %1, %2, %cst {dimension_numbers = #tpu.dot_dimension_numbers<[1], [0], [0], [1], [0, 0, 1, 1], [], []>} : vector<8x128xbf16>, vector<128x1024xbf16>, vector<8x1024xf32> -> vector<8x1024xf32>
    %c0_3 = arith.constant 0 : index
    %c0_4 = arith.constant 0 : index
    %4 = vector.load %arg3[%c0_3, %c0_4] : memref<1x1024xf32, #tpu.memory_space<vmem>>, vector<1x1024xf32>
    %5 = vector.broadcast %4 : vector<1x1024xf32> to vector<8x1024xf32>
    %6 = arith.addf %3, %5 : vector<8x1024xf32>
    %cst_5 = arith.constant 0.000000e+00 : f32
    %7 = vector.broadcast %cst_5 : f32 to vector<8x1024xf32>
    %8 = arith.maximumf %6, %7 : vector<8x1024xf32>
    %9 = arith.truncf %8 : vector<8x1024xf32> to vector<8x1024xbf16>
    %c0_6 = arith.constant 0 : index
    %c0_7 = arith.constant 0 : index
    %10 = vector.load %arg4[%c0_6, %c0_7] : memref<1024x128xbf16, #tpu.memory_space<vmem>>, vector<1024x128xbf16>
    %cst_8 = arith.constant dense<0.000000e+00> : vector<8x128xf32>
    %11 = tpu.matmul %9, %10, %cst_8 {dimension_numbers = #tpu.dot_dimension_numbers<[1], [0], [0], [1], [0, 0, 1, 1], [], []>} : vector<8x1024xbf16>, vector<1024x128xbf16>, vector<8x128xf32> -> vector<8x128xf32>
    %c0_9 = arith.constant 0 : index
    %c0_10 = arith.constant 0 : index
    %12 = vector.load %arg5[%c0_9, %c0_10] : memref<1x128xf32, #tpu.memory_space<vmem>>, vector<1x128xf32>
    %13 = vector.broadcast %12 : vector<1x128xf32> to vector<8x128xf32>
    %14 = arith.addf %11, %13 : vector<8x128xf32>
    %c0_11 = arith.constant 0 : index
    %c0_12 = arith.constant 0 : index
    %15 = vector.load %arg6[%c0_11, %c0_12] : memref<8x128xf32, #tpu.memory_space<vmem>>, vector<8x128xf32>
    tpu.vector_store %arg6[%c0_11, %c0_12], %14 {strides = array<i32>} : memref<8x128xf32, #tpu.memory_space<vmem>>, vector<8x128xf32>,
    return
  }
  func.func @transform_0(%arg0: i32) -> (i32, i32) {
    %c0_i32 = arith.constant 0 : i32
    %c0_i32_0 = arith.constant 0 : i32
    return %arg0, %c0_i32 : i32, i32
  }
  func.func @transform_1(%arg0: i32) -> (i32, i32) {
    %c0_i32 = arith.constant 0 : i32
    %c0_i32_0 = arith.constant 0 : i32
    %c0_i32_1 = arith.constant 0 : i32
    return %c0_i32, %c0_i32_0 : i32, i32
  }
  func.func @transform_2(%arg0: i32) -> (i32, i32) {
    %c0_i32 = arith.constant 0 : i32
    %c0_i32_0 = arith.constant 0 : i32
    %c0_i32_1 = arith.constant 0 : i32
    return %c0_i32, %c0_i32_0 : i32, i32
  }
  func.func @transform_3(%arg0: i32) -> (i32, i32) {
    %c0_i32 = arith.constant 0 : i32
    %c0_i32_0 = arith.constant 0 : i32
    %c0_i32_1 = arith.constant 0 : i32
    return %c0_i32, %c0_i32_0 : i32, i32
  }
  func.func @transform_4(%arg0: i32) -> (i32, i32) {
    %c0_i32 = arith.constant 0 : i32
    %c0_i32_0 = arith.constant 0 : i32
    %c0_i32_1 = arith.constant 0 : i32
    return %c0_i32, %c0_i32_0 : i32, i32
  }
  func.func @transform_5(%arg0: i32) -> (i32, i32) {
    %c0_i32 = arith.constant 0 : i32
    %c0_i32_0 = arith.constant 0 : i32
    return %arg0, %c0_i32 : i32, i32
  }
}

</mosaic_0001>

<bundles_post_ra>
// kernel: feed_forward.1
= control target key start
LH: loop header
LB: loop body
LE: loop exit
PB: predicated region body
PF: predicated region fallthrough
CT: control target
= control target key end

     0   :  { %10 = vsyncpa [#allocation3], 0  ;;  %s2529_s0 = inlined_call_operand.vmem [shape: f32[16,128], index: 0, kind: input, shape index: {}]   ;;  %s2530_s1 = inlined_call_operand.vmem [shape: bf16[128,1024], index: 1, kind: input, shape index: {}]   ;;  %s2531_s2 = inlined_call_operand.vmem [shape: f32[1,1024], index: 2, kind: input, shape index: {}]   ;;  %s2532_s3 = inlined_call_operand.vmem [shape: bf16[1024,128], index: 3, kind: input, shape index: {}]   ;;  %s2533_s4 = inlined_call_operand.vmem [shape: f32[1,128], index: 4, kind: input, shape index: {}]   ;;  %s2534_s5 = inlined_call_operand.hbm [shape: f32[16,128], index: 5, kind: output, shape index: {}]  }
   0x1   :  { %12 = vsyncpa [#allocation3 + $0x1], 0  ;;  %s2009_s18 = smov 0   ;;  %s2011_s19 = smov 0  }
   0x2   :  { %s2013_s20 = smov 0   ;;  %s2015_s21 = smov 0  }
   0x3 LB: > { %s2030_s22 = sadd.s32 4294967295, %s1975_s21   ;;  %s1582_s23 = sadd.s32 4294967294, %s1975_s21   ;;  %s1975_s21 = sphi %s2015_s21, %s2540_s21   ;;  %s1971_s20 = sphi %s2013_s20, %s2539_s20   ;;  %s1967_s19 = sphi %s2011_s19, %s2538_s19   ;;  %s1963_s18 = sphi %s2009_s18, %s2537_s18  }
   0x4   : > { %s2034_s24 = sadd.s32 1, %s1975_s21   ;;  %s135_s25 = sadd.s32 1, %s1971_s20 }
   0x5   : > { %s132_s26 = ssub.s32 %s1975_s21, %s2034_s24  ;;  %p145_p0 = scmp.ne.s32.totalorder %s1971_s20, %s1967_s19 }
   0x6   : > { %p133_p1 = scmp.eq.s32.totalorder %s132_s26, 0  ;;  %p146_p2 = scmp.eq.s32.totalorder %s2030_s22, 1 }
   0x7   : > { %p151_p3 = scmp.ne.s32.totalorder %s1967_s19, %s1963_s18  ;;  %p152_p4 = scmp.eq.s32.totalorder %s1582_s23, 1 }
   0x8   : > { %s2045_s27 = scalar_select %p133_p1, %s1971_s20, %s135_s25  }
   0x9   : > { %p2047_p5 = por %p146_p2, %p145_p0  ;;  %p2051_p6 = por %p152_p4, %p151_p3 }
   0xa   : > { %p1585_p7 = scmp.ge.s32.totalorder %s1975_s21, 1  ;;  %p189_p8 = scmp.lt.s32.totalorder %s1975_s21, 3 }
   0xc   : > { %p190_p9 = pnand %p1585_p7, %p189_p8 }
   0xd   : > { %v223_v0 = vld [vmem:[%s2530_s1] sm:$0xff] (!%p190_p9)  ;;  %v224_v2 = vld [vmem:[%s2530_s1 + $0x8] sm:$0xff] (!%p190_p9)  ;;  %v1977_v8 = vmov (!%p190_p9), 0   ;;  %p216_p10 = scmp.lt.s32.totalorder (!%p190_p9), %s2030_s22, 1  ;;  %v225_v60 = vld [vmem:[%s2530_s1 + $0x10] sm:$0xff] (!%p190_p9)  ;;  %s213_s15 = sand.u32 (!%p190_p9), 1, %s1967_s19  }
   0xe   : > { %193 = sbr.rel (%p190_p9) target bundleno = 534 (0x216), region = 40  ;;  %v227_v1 = vld [vmem:[%s2530_s1 + $0x20] sm:$0xff] (!%p190_p9)  ;;  %v228_v4 = vld [vmem:[%s2530_s1 + $0x28] sm:$0xff] (!%p190_p9)  ;;  %681 = vmatprep.mubr.bf16.mxu0 (!%p190_p9), %v1977_v8  ;;  %722 = vmatprep.mubr.bf16.mxu1 (!%p190_p9), %v1977_v8  ;;  %v229_v63 = vld [vmem:[%s2530_s1 + $0x30] sm:$0xff] (!%p190_p9)  ;;  %s1586_s16 = sshll.u32 (!%p190_p9), %s213_s15, 3 }
   0xf   : > { %v1589_v3 = vcombine.high (!%p190_p9), %v223_v0, %v227_v1  ;;  %v1588_v5 = vcombine.low (!%p190_p9), %v223_v0, %v227_v1  ;;  %v231_v6 = vld [vmem:[%s2530_s1 + $0x40] sm:$0xff] (!%p190_p9)  ;;  %v1591_v9 = vcombine.high (!%p190_p9), %v224_v2, %v228_v4  ;;  %v1590_v10 = vcombine.low (!%p190_p9), %v224_v2, %v228_v4  ;;  %v232_v12 = vld [vmem:[%s2530_s1 + $0x48] sm:$0xff] (!%p190_p9)  ;;  %v226_v2 = vld [vmem:[%s2530_s1 + $0x18] sm:$0xff] (!%p190_p9)  ;;  %s215_s17 = scalar_lea.vmem (!%p190_p9), [#allocation2], %s1586_s16 }
  0x10   : > { %v235_v7 = vld [vmem:[%s2530_s1 + $0x60] sm:$0xff] (!%p190_p9)  ;;  %v236_v13 = vld [vmem:[%s2530_s1 + $0x68] sm:$0xff] (!%p190_p9)  ;;  %s1523_s23 = sshll.u32 (!%p190_p9), %s215_s17, 4  ;;  %s2489_s23 = int_to_ptr.vmem [resolvable:$true] %s1523_s23 }
  0x11   : > { %v1597_v11 = vcombine.high (!%p190_p9), %v231_v6, %v235_v7  ;;  %v239_v14 = vld [vmem:[%s2530_s1 + $0x80] sm:$0xff] (!%p190_p9)  ;;  %649 = vmatprep.subr.bf16.mxu0 (!%p190_p9), %v1589_v3  ;;  %v1599_v15 = vcombine.high (!%p190_p9), %v232_v12, %v236_v13  ;;  %v240_v17 = vld [vmem:[%s2530_s1 + $0x88] sm:$0xff] (!%p190_p9)  ;;  %690 = vmatprep.subr.bf16.mxu1 (!%p190_p9), %v1591_v9  ;;  %v1596_v19 = vcombine.low (!%p190_p9), %v231_v6, %v235_v7  ;;  %v230_v3 = vld [vmem:[%s2530_s1 + $0x38] sm:$0xff] (!%p190_p9)  ;;  %s1913_s7 = scalar_lea.vmem (!%p190_p9), %s2489_s23, 128 }
  0x12   : > { %v243_v16 = vld [vmem:[%s2530_s1 + $0xa0] sm:$0xff] (!%p190_p9)  ;;  %v244_v18 = vld [vmem:[%s2530_s1 + $0xa8] sm:$0xff] (!%p190_p9)  ;;  %650 = vmatpush1.bf16.msra.mxu0 (!%p190_p9), %v1588_v5  ;;  %691 = vmatpush1.bf16.msra.mxu1 (!%p190_p9), %v1590_v10  ;;  %v1598_v20 = vcombine.low (!%p190_p9), %v232_v12, %v236_v13  ;;  %v233_v5 = vld [vmem:[%s2530_s1 + $0x50] sm:$0xff] (!%p190_p9)  ;;  %v1593_v7 = vcombine.high (!%p190_p9), %v225_v60, %v229_v63  ;;  %v1595_v10 = vcombine.high (!%p190_p9), %v226_v2, %v230_v3  ;;  %p1914_p11 = scmp.ne.s32.totalorder (!%p190_p9), %s2489_s23, %s1913_s7 }
  0x13   : > { %651 = vmatprep.subr.bf16.mxu0 (!%p190_p9), %v1597_v11  ;;  %v1605_v21 = vcombine.high (!%p190_p9), %v239_v14, %v243_v16  ;;  %692 = vmatprep.subr.bf16.mxu1 (!%p190_p9), %v1599_v15  ;;  %v1607_v22 = vcombine.high (!%p190_p9), %v240_v17, %v244_v18  ;;  %v247_v23 = vld [vmem:[%s2530_s1 + $0xc0] sm:$0xff] (!%p190_p9)  ;;  %v248_v25 = vld [vmem:[%s2530_s1 + $0xc8] sm:$0xff] (!%p190_p9)  ;;  %v1604_v27 = vcombine.low (!%p190_p9), %v239_v14, %v243_v16  ;;  %v237_v9 = vld [vmem:[%s2530_s1 + $0x70] sm:$0xff] (!%p190_p9) }
  0x14   : > { %v251_v24 = vld [vmem:[%s2530_s1 + $0xe0] sm:$0xff] (!%p190_p9)  ;;  %v252_v26 = vld [vmem:[%s2530_s1 + $0xe8] sm:$0xff] (!%p190_p9)  ;;  %v1606_v28 = vcombine.low (!%p190_p9), %v240_v17, %v244_v18  ;;  %v234_v11 = vld [vmem:[%s2530_s1 + $0x58] sm:$0xff] (!%p190_p9)  ;;  %v1592_v14 = vcombine.low (!%p190_p9), %v225_v60, %v229_v63  ;;  %v1594_v16 = vcombine.low (!%p190_p9), %v226_v2, %v230_v3  ;;  %v1601_v17 = vcombine.high (!%p190_p9), %v233_v5, %v237_v9  ;;  %p1915_p12 = pnand (!%p190_p9), %p1914_p11, %p2047_p5 }
  0x15   : > { %v1613_v29 = vcombine.high %v247_v23, %v251_v24  ;;  %v1615_v30 = vcombine.high %v248_v25, %v252_v26  ;;  %v255_v31 = vld [vmem:[%s2530_s1 + $0x100] sm:$0xff]  ;;  %v256_v33 = vld [vmem:[%s2530_s1 + $0x108] sm:$0xff]  ;;  %v1612_v35 = vcombine.low %v247_v23, %v251_v24  ;;  %v1614_v36 = vcombine.low %v248_v25, %v252_v26  ;;  %s217_s30 = scalar_select %p216_p10, %s2030_s22, 1  ;;  %v238_v13 = vld [vmem:[%s2530_s1 + $0x78] sm:$0xff] }
  0x16   : > { %652 = vmatpush1.bf16.msra.mxu0 %v1596_v19  ;;  %693 = vmatpush1.bf16.msra.mxu1 %v1598_v20  ;;  %v259_v32 = vld [vmem:[%s2530_s1 + $0x120] sm:$0xff]  ;;  %v260_v34 = vld [vmem:[%s2530_s1 + $0x128] sm:$0xff]  ;;  %v241_v15 = vld [vmem:[%s2530_s1 + $0x90] sm:$0xff]  ;;  %v1603_v19 = vcombine.high %v234_v11, %v238_v13  ;;  %v1602_v24 = vcombine.low %v234_v11, %v238_v13  ;;  %p1916_p13 = pneg %p1915_p12 }
  0x17   : > { %653 = vmatprep.subr.bf16.mxu0 %v1605_v21  ;;  %694 = vmatprep.subr.bf16.mxu1 %v1607_v22  ;;  %v1621_v37 = vcombine.high %v255_v31, %v259_v32  ;;  %v1623_v38 = vcombine.high %v256_v33, %v260_v34  ;;  %v263_v39 = vld [vmem:[%s2530_s1 + $0x140] sm:$0xff]  ;;  %v264_v41 = vld [vmem:[%s2530_s1 + $0x148] sm:$0xff]  ;;  %v1620_v43 = vcombine.low %v255_v31, %v259_v32  ;;  %s1587_s14 = sshll.u32 %s217_s30, 3  ;;  %v245_v18 = vld [vmem:[%s2530_s1 + $0xb0] sm:$0xff]  ;;  %s1510_s30 = scalar_lea.sflag [#allocation3], %s213_s15 }
  0x18   : > { %v267_v40 = vld [vmem:[%s2530_s1 + $0x160] sm:$0xff]  ;;  %v268_v42 = vld [vmem:[%s2530_s1 + $0x168] sm:$0xff]  ;;  %v1622_v44 = vcombine.low %v256_v33, %v260_v34  ;;  %s219_s9 = scalar_lea.vmem %s2529_s0, %s1587_s14  ;;  %v242_v20 = vld [vmem:[%s2530_s1 + $0x98] sm:$0xff]  ;;  %v1600_v22 = vcombine.low %v233_v5, %v237_v9  ;;  %v1609_v25 = vcombine.high %v241_v15, %v245_v18  ;;  %s1718_s14 = sshll.u32 %s2030_s22, 7 }
  0x19   : > { %v1629_v45 = vcombine.high %v263_v39, %v267_v40  ;;  %v1631_v46 = vcombine.high %v264_v41, %v268_v42  ;;  %v271_v47 = vld [vmem:[%s2530_s1 + $0x180] sm:$0xff]  ;;  %v272_v49 = vld [vmem:[%s2530_s1 + $0x188] sm:$0xff]  ;;  %v1628_v51 = vcombine.low %v263_v39, %v267_v40  ;;  %v1630_v52 = vcombine.low %v264_v41, %v268_v42  ;;  %v246_v21 = vld [vmem:[%s2530_s1 + $0xb8] sm:$0xff]  ;;  %s2487_s6 = scalar_lea.hbm %s2534_s5, %s1718_s14  ;;  %s1978_s22 = smov [#allocation2]  }
  0x1a   : > { %654 = vmatpush1.bf16.msra.mxu0 %v1604_v27  ;;  %695 = vmatpush1.bf16.msra.mxu1 %v1606_v28  ;;  %v275_v48 = vld [vmem:[%s2530_s1 + $0x1a0] sm:$0xff]  ;;  %v276_v50 = vld [vmem:[%s2530_s1 + $0x1a8] sm:$0xff]  ;;  %v249_v23 = vld [vmem:[%s2530_s1 + $0xd0] sm:$0xff]  ;;  %v1611_v27 = vcombine.high %v242_v20, %v246_v21  ;;  %v1610_v32 = vcombine.low %v242_v20, %v246_v21  ;;  %s1917_s8 = sshll.u32 %s1978_s22, 4  ;;  %s1918_s8 = int_to_ptr.vmem [resolvable:$false] %s1917_s8 }
  0x1b   : > { %655 = vmatprep.subr.bf16.mxu0 %v1613_v29  ;;  %696 = vmatprep.subr.bf16.mxu1 %v1615_v30  ;;  %v1637_v53 = vcombine.high %v271_v47, %v275_v48  ;;  %v279_v54 = vld [vmem:[%s2530_s1 + $0x1c0] sm:$0xff]  ;;  %v1639_v56 = vcombine.high %v272_v49, %v276_v50  ;;  %v280_v57 = vld [vmem:[%s2530_s1 + $0x1c8] sm:$0xff]  ;;  %v1636_v59 = vcombine.low %v271_v47, %v275_v48  ;;  %v253_v26 = vld [vmem:[%s2530_s1 + $0xf0] sm:$0xff]  ;;  %p1920_p0 = scmp.lt.s32.totalorder %s2489_s23, %s1918_s8 }
  0x1c   : > { %v283_v55 = vld [vmem:[%s2530_s1 + $0x1e0] sm:$0xff]  ;;  %v284_v58 = vld [vmem:[%s2530_s1 + $0x1e8] sm:$0xff]  ;;  %v1638_v61 = vcombine.low %v272_v49, %v276_v50  ;;  %v250_v28 = vld [vmem:[%s2530_s1 + $0xd8] sm:$0xff]  ;;  %v1608_v30 = vcombine.low %v241_v15, %v245_v18  ;;  %v1617_v33 = vcombine.high %v249_v23, %v253_v26 }
  0x1d   : > { %v1645_v62 = vcombine.high %v279_v54, %v283_v55  ;;  %v1647_v0 = vcombine.high %v280_v57, %v284_v58  ;;  %v221_v1 = vld [vmem:[%s219_s9] sm:$0xff]  ;;  %v1644_v4 = vcombine.low %v279_v54, %v283_v55  ;;  %v1646_v6 = vcombine.low %v280_v57, %v284_v58  ;;  %v254_v29 = vld [vmem:[%s2530_s1 + $0xf8] sm:$0xff]  ;;  %v257_v31 = vld [vmem:[%s2530_s1 + $0x110] sm:$0xff]  ;;  %s1919_s9 = scalar_lea.vmem %s1918_s8, 256 }
  0x1e   : > { %656 = vmatpush1.bf16.msra.mxu0 %v1612_v35  ;;  %697 = vmatpush1.bf16.msra.mxu1 %v1614_v36  ;;  %v2181_v12 = vpack.c.bf16 %v221_v1, %v221_v1  ;;  %v261_v34 = vld [vmem:[%s2530_s1 + $0x130] sm:$0xff]  ;;  %v1619_v35 = vcombine.high %v250_v28, %v254_v29  ;;  %v262_v36 = vld [vmem:[%s2530_s1 + $0x138] sm:$0xff]  ;;  %v1618_v40 = vcombine.low %v250_v28, %v254_v29  ;;  %v1849_v1 = vld [vmem:[%s2532_s3 + $0x40] sm:$0xff]   ;;  %p1921_p1 = scmp.lt.s32.totalorder %s1919_s9, %s1913_s7 }
  0x1f   : > { %657 = vmatprep.subr.bf16.mxu0 %v1621_v37  ;;  %698 = vmatprep.subr.bf16.mxu1 %v1623_v38  ;;  %v1616_v37 = vcombine.low %v249_v23, %v253_v26  ;;  %v265_v38 = vld [vmem:[%s2530_s1 + $0x150] sm:$0xff]  ;;  %v1625_v41 = vcombine.high %v257_v31, %v261_v34  ;;  %v266_v42 = vld [vmem:[%s2530_s1 + $0x158] sm:$0xff]  ;;  %v1850_v3 = vld [vmem:[%s2532_s3 + $0xc0] sm:$0xff]  }
  0x20   : > { %v269_v39 = vld [vmem:[%s2530_s1 + $0x170] sm:$0xff]  ;;  %v274_v50 = vld [vmem:[%s2530_s1 + $0x198] sm:$0xff]  ;;  %v1851_v5 = vld [vmem:[%s2532_s3] sm:$0xff]   ;;  %p1922_p2 = por %p1921_p1, %p1920_p0 }
  0x21   : > { %v277_v47 = vld [vmem:[%s2530_s1 + $0x1b0] sm:$0xff]  ;;  %v1633_v49 = vcombine.high %v265_v38, %v269_v39  ;;  %v282_v58 = vld [vmem:[%s2530_s1 + $0x1d8] sm:$0xff]  ;;  %v1854_v9 = vld [vmem:[%s2532_s3 + $0xc8] sm:$0xff]  }
  0x22   : > { %658 = vmatpush1.bf16.msra.mxu0 %v1620_v43  ;;  %699 = vmatpush1.bf16.msra.mxu1 %v1622_v44  ;;  %v270_v43 = vld [vmem:[%s2530_s1 + $0x178] sm:$0xff]  ;;  %v281_v54 = vld [vmem:[%s2530_s1 + $0x1d0] sm:$0xff]  ;;  %v1856_v11 = vld [vmem:[%s2532_s3 + $0x88] sm:$0xff]   ;;  %p1923_p3 = pnand %p1922_p2, %p1916_p13 }
  0x23   : > { %659 = vmatprep.subr.bf16.mxu0 %v1629_v45  ;;  %700 = vmatprep.subr.bf16.mxu1 %v1631_v46  ;;  %v1624_v45 = vcombine.low %v257_v31, %v261_v34  ;;  %v273_v46 = vld [vmem:[%s2530_s1 + $0x190] sm:$0xff]  ;;  %v1863_v18 = vld [vmem:[%s2532_s3 + $0x18] sm:$0xff]   ;;  %v1865_v20 = vld [vmem:[%s2532_s3 + $0x60] sm:$0xff]  }
  0x24   : > { %v285_v55 = vld [vmem:[%s2530_s1 + $0x1f0] sm:$0xff]  ;;  %v1641_v57 = vcombine.high %v273_v46, %v277_v47  ;;  %v1866_v21 = vld [vmem:[%s2532_s3 + $0xe0] sm:$0xff]   ;;  %v1871_v26 = vld [vmem:[%s2532_s3 + $0x28] sm:$0xff]  }
  0x25   : > { %v1649_v63 = vcombine.high %v281_v54, %v285_v55  ;;  %v1648_v2 = vcombine.low %v281_v54, %v285_v55  ;;  %v1857_v13 = vld [vmem:[%s2532_s3 + $0x50] sm:$0xff]   ;;  %v1868_v23 = vld [vmem:[%s2532_s3 + $0xa0] sm:$0xff]   ;;  %v1879_v34 = vld [vmem:[%s2532_s3 + $0x38] sm:$0xff]  }
  0x26   : > { %660 = vmatpush1.bf16.msra.mxu0 %v1628_v51  ;;  %701 = vmatpush1.bf16.msra.mxu1 %v1630_v52  ;;  %v278_v51 = vld [vmem:[%s2530_s1 + $0x1b8] sm:$0xff]  ;;  %v1635_v52 = vcombine.high %v266_v42, %v270_v43  ;;  %v1859_v15 = vld [vmem:[%s2532_s3 + $0x10] sm:$0xff]  }
  0x27   : > { %661 = vmatprep.subr.bf16.mxu0 %v1637_v53  ;;  %702 = vmatprep.subr.bf16.mxu1 %v1639_v56  ;;  %v1632_v53 = vcombine.low %v265_v38, %v269_v39  ;;  %v1634_v56 = vcombine.low %v266_v42, %v270_v43  ;;  %v1643_v60 = vcombine.high %v274_v50, %v278_v51  ;;  %v1873_v28 = vld [vmem:[%s2532_s3 + $0x70] sm:$0xff]  }
  0x28   : > { %v1874_v29 = vld [vmem:[%s2532_s3 + $0xf0] sm:$0xff]  }
  0x29   : > { %v1876_v31 = vld [vmem:[%s2532_s3 + $0xb0] sm:$0xff]  }
  0x2a   : > { %662 = vmatpush1.bf16.msra.mxu0 %v1636_v59  ;;  %703 = vmatpush1.bf16.msra.mxu1 %v1638_v61  ;;  %v286_v59 = vld [vmem:[%s2530_s1 + $0x1f8] sm:$0xff]  ;;  %v1640_v61 = vcombine.low %v273_v46, %v277_v47 }
  0x2b   : > { %663 = vmatprep.subr.bf16.mxu0 %v1645_v62  ;;  %704 = vmatprep.subr.bf16.mxu1 %v1647_v0  ;;  %v1642_v62 = vcombine.low %v274_v50, %v278_v51  ;;  %v1651_v0 = vcombine.high %v282_v58, %v286_v59 }
  0x2e   : > { %664 = vmatpush1.bf16.msra.mxu0 %v1644_v4  ;;  %705 = vmatpush1.bf16.msra.mxu1 %v1646_v6  ;;  %v1650_v4 = vcombine.low %v282_v58, %v286_v59  ;;  %v1852_v6 = vld [vmem:[%s2532_s3 + $0x80] sm:$0xff]  }
  0x2f   : > { %731 = vmatprep.subr.bf16.mxu0 %v1593_v7  ;;  %772 = vmatprep.subr.bf16.mxu1 %v1595_v10  ;;  %v1853_v7 = vld [vmem:[%s2532_s3 + $0x48] sm:$0xff]  }
  0x30   : > { %v1855_v10 = vld [vmem:[%s2532_s3 + $0x8] sm:$0xff]  }
  0x31   : > { %682 = vmatmul.mubr.bf16.vlgmr.msra.gmra.mrb[0].mxu0 %v2181_v12  ;;  %723 = vmatmul.mubr.bf16.vlgmr.msra.gmra.mrb[0].mxu1 %v2181_v12 }
  0x32   : > { %732 = vmatpush1.bf16.msra.mxu0 %v1592_v14  ;;  %773 = vmatpush1.bf16.msra.mxu1 %v1594_v16  ;;  %v1858_v14 = vld [vmem:[%s2532_s3 + $0xd0] sm:$0xff]  }
  0x33   : > { %733 = vmatprep.subr.bf16.mxu0 %v1601_v17  ;;  %774 = vmatprep.subr.bf16.mxu1 %v1603_v19  ;;  %v1860_v16 = vld [vmem:[%s2532_s3 + $0x90] sm:$0xff]   ;;  %v1862_v17 = vld [vmem:[%s2532_s3 + $0xd8] sm:$0xff]  }
  0x34   : > { %763 = vmatprep.mubr.bf16.mxu0 %v1977_v8  ;;  %804 = vmatprep.mubr.bf16.mxu1 %v1977_v8  ;;  %v258_v8 = vld [vmem:[%s2530_s1 + $0x118] sm:$0xff] }
  0x35   : > { %v1627_v44 = vcombine.high %v258_v8, %v262_v36  ;;  %v1626_v48 = vcombine.low %v258_v8, %v262_v36  ;;  %v1864_v19 = vld [vmem:[%s2532_s3 + $0x98] sm:$0xff]   ;;  %v1881_v8 = vld [vmem:[%s2532_s3 + $0x140] sm:$0xff]  }
  0x36   : > { %734 = vmatpush1.bf16.msra.mxu0 %v1600_v22  ;;  %775 = vmatpush1.bf16.msra.mxu1 %v1602_v24  ;;  %v1867_v22 = vld [vmem:[%s2532_s3 + $0x20] sm:$0xff]   ;;  %v1869_v24 = vld [vmem:[%s2532_s3 + $0x68] sm:$0xff]  }
  0x37   : > { %735 = vmatprep.subr.bf16.mxu0 %v1609_v25  ;;  %776 = vmatprep.subr.bf16.mxu1 %v1611_v27  ;;  %v1870_v25 = vld [vmem:[%s2532_s3 + $0xe8] sm:$0xff]   ;;  %v1882_v36 = vld [vmem:[%s2532_s3 + $0x1c0] sm:$0xff]  }
  0x38   : > { %v1872_v27 = vld [vmem:[%s2532_s3 + $0xa8] sm:$0xff]  }
  0x3a   : > { %736 = vmatpush1.bf16.msra.mxu0 %v1608_v30  ;;  %777 = vmatpush1.bf16.msra.mxu1 %v1610_v32  ;;  %v1875_v30 = vld [vmem:[%s2532_s3 + $0x30] sm:$0xff]   ;;  %v1877_v32 = vld [vmem:[%s2532_s3 + $0x78] sm:$0xff]  }
  0x3b   : > { %737 = vmatprep.subr.bf16.mxu0 %v1617_v33  ;;  %778 = vmatprep.subr.bf16.mxu1 %v1619_v35  ;;  %v1878_v33 = vld [vmem:[%s2532_s3 + $0xf8] sm:$0xff]  }
  0x3c   : > { %v1880_v35 = vld [vmem:[%s2532_s3 + $0xb8] sm:$0xff]  }
  0x3e   : > { %738 = vmatpush1.bf16.msra.mxu0 %v1616_v37  ;;  %779 = vmatpush1.bf16.msra.mxu1 %v1618_v40  ;;  %v289_v37 = vlaneseq  ;;  %v2372_v40 = vld [vmem:[%s2531_s2] sm:$0xff] }
  0x3f   : > { %739 = vmatprep.subr.bf16.mxu0 %v1625_v41  ;;  %780 = vmatprep.subr.bf16.mxu1 %v1627_v44 }
  0x40   : > { %v2366_v38 = vshrl.u32 %v289_v37, 7  ;;  %v1908_v37 = vld [vmem:[%s2532_s3 + $0x1b0] sm:$0xff]  }
  0x42   : > { %740 = vmatpush1.bf16.msra.mxu0 %v1624_v45  ;;  %781 = vmatpush1.bf16.msra.mxu1 %v1626_v48  ;;  %v291_v39 = vsub.s32 0, %v2366_v38  ;;  %v299_v41 = vsub.s32 2, %v2366_v38  ;;  %v295_v42 = vsub.s32 1, %v2366_v38  ;;  %v303_v43 = vsub.s32 3, %v2366_v38 }
  0x43   : > { %741 = vmatprep.subr.bf16.mxu0 %v1633_v49  ;;  %782 = vmatprep.subr.bf16.mxu1 %v1635_v52 }
  0x44   : > { %v292_v44 = vrot.slane %v2372_v40, %v291_v39  ;;  %v300_v45 = vrot.slane %v2372_v40, %v299_v41  ;;  %v296_v46 = vrot.slane %v2372_v40, %v295_v42  ;;  %v304_v47 = vrot.slane %v2372_v40, %v303_v43  ;;  %v1910_v41 = vld [vmem:[%s2532_s3 + $0x1f8] sm:$0xff]  }
  0x46   : > { %742 = vmatpush1.bf16.msra.mxu0 %v1632_v53  ;;  %783 = vmatpush1.bf16.msra.mxu1 %v1634_v56 }
  0x47   : > { %743 = vmatprep.subr.bf16.mxu0 %v1641_v57  ;;  %784 = vmatprep.subr.bf16.mxu1 %v1643_v60 }
  0x4a   : > { %744 = vmatpush1.bf16.msra.mxu0 %v1640_v61  ;;  %785 = vmatpush1.bf16.msra.mxu1 %v1642_v62 }
  0x4b   : > { %745 = vmatprep.subr.bf16.mxu0 %v1649_v63  ;;  %786 = vmatprep.subr.bf16.mxu1 %v1651_v0 }
  0x4e   : > { %746 = vmatpush1.bf16.msra.mxu0 %v1648_v2  ;;  %787 = vmatpush1.bf16.msra.mxu1 %v1650_v4 }
  0x4f   : > { %1721 = vmatprep.subr.bf16.mxu0 %v1849_v1  ;;  %1743 = vmatprep.subr.bf16.mxu1 %v1850_v3  ;;  %v1883_v3 = vld [vmem:[%s2532_s3 + $0x100] sm:$0xff]  }
  0x51   : > { %764 = vmatmul.mubr.bf16.vlgmr.msra.gmra.mrb[4].mxu0 %v2181_v12  ;;  %805 = vmatmul.mubr.bf16.vlgmr.msra.gmra.mrb[4].mxu1 %v2181_v12  ;;  %v1861_v12 = vld [vmem:[%s2532_s3 + $0x58] sm:$0xff]  }
  0x52   : > { %1722 = vmatpush3.bf16.msra.mxu0 %v1851_v5  ;;  %1744 = vmatpush3.bf16.msra.mxu1 %v1852_v6  ;;  %v1884_v5 = vld [vmem:[%s2532_s3 + $0x180] sm:$0xff]   ;;  %v1885_v6 = vld [vmem:[%s2532_s3 + $0x148] sm:$0xff]  }
  0x53   : > { %1723 = vmatprep.subr.bf16.mxu0 %v1853_v7  ;;  %1745 = vmatprep.subr.bf16.mxu1 %v1854_v9  ;;  %v1886_v7 = vld [vmem:[%s2532_s3 + $0x1c8] sm:$0xff]  }
  0x54   : > { %v1887_v9 = vld [vmem:[%s2532_s3 + $0x108] sm:$0xff]  }
  0x56   : > { %1724 = vmatpush3.bf16.msra.mxu0 %v1855_v10  ;;  %1746 = vmatpush3.bf16.msra.mxu1 %v1856_v11  ;;  %v1888_v10 = vld [vmem:[%s2532_s3 + $0x188] sm:$0xff]   ;;  %v1889_v11 = vld [vmem:[%s2532_s3 + $0x150] sm:$0xff]  }
  0x57   : > { %1725 = vmatprep.subr.bf16.mxu0 %v1857_v13  ;;  %1747 = vmatprep.subr.bf16.mxu1 %v1858_v14  ;;  %v1890_v13 = vld [vmem:[%s2532_s3 + $0x1d0] sm:$0xff]  }
  0x58   : > { %v1891_v14 = vld [vmem:[%s2532_s3 + $0x110] sm:$0xff]  }
  0x5a   : > { %1726 = vmatpush3.bf16.msra.mxu0 %v1859_v15  ;;  %1748 = vmatpush3.bf16.msra.mxu1 %v1860_v16  ;;  %v1892_v15 = vld [vmem:[%s2532_s3 + $0x190] sm:$0xff]   ;;  %v1893_v16 = vld [vmem:[%s2532_s3 + $0x158] sm:$0xff]  }
  0x5b   : > { %1727 = vmatprep.subr.bf16.mxu0 %v1861_v12  ;;  %1749 = vmatprep.subr.bf16.mxu1 %v1862_v17  ;;  %v1894_v12 = vld [vmem:[%s2532_s3 + $0x1d8] sm:$0xff]  }
  0x5c   : > { %v1895_v17 = vld [vmem:[%s2532_s3 + $0x118] sm:$0xff]  }
  0x5e   : > { %1728 = vmatpush3.bf16.msra.mxu0 %v1863_v18  ;;  %1750 = vmatpush3.bf16.msra.mxu1 %v1864_v19  ;;  %v1896_v18 = vld [vmem:[%s2532_s3 + $0x198] sm:$0xff]   ;;  %v1897_v19 = vld [vmem:[%s2532_s3 + $0x160] sm:$0xff]  }
  0x5f   : > { %1729 = vmatprep.subr.bf16.mxu0 %v1865_v20  ;;  %1751 = vmatprep.subr.bf16.mxu1 %v1866_v21  ;;  %v1898_v20 = vld [vmem:[%s2532_s3 + $0x1e0] sm:$0xff]  }
  0x60   : > { %v1899_v21 = vld [vmem:[%s2532_s3 + $0x120] sm:$0xff]  }
  0x62   : > { %1730 = vmatpush3.bf16.msra.mxu0 %v1867_v22  ;;  %1752 = vmatpush3.bf16.msra.mxu1 %v1868_v23  ;;  %v1900_v22 = vld [vmem:[%s2532_s3 + $0x1a0] sm:$0xff]   ;;  %v1901_v23 = vld [vmem:[%s2532_s3 + $0x168] sm:$0xff]  }
  0x63   : > { %1731 = vmatprep.subr.bf16.mxu0 %v1869_v24  ;;  %1753 = vmatprep.subr.bf16.mxu1 %v1870_v25  ;;  %v1902_v24 = vld [vmem:[%s2532_s3 + $0x1e8] sm:$0xff]   ;;  %v307_v25 = vsub.s32 4, %v2366_v38 }
  0x66   : > { %1732 = vmatpush3.bf16.msra.mxu0 %v1871_v26  ;;  %1754 = vmatpush3.bf16.msra.mxu1 %v1872_v27  ;;  %v1903_v26 = vld [vmem:[%s2532_s3 + $0x128] sm:$0xff]   ;;  %v315_v27 = vsub.s32 6, %v2366_v38 }
  0x67   : > { %1733 = vmatprep.subr.bf16.mxu0 %v1873_v28  ;;  %1755 = vmatprep.subr.bf16.mxu1 %v1874_v29  ;;  %v311_v28 = vsub.s32 5, %v2366_v38  ;;  %v1904_v29 = vld [vmem:[%s2532_s3 + $0x1a8] sm:$0xff]  }
  0x6a   : > { %1734 = vmatpush3.bf16.msra.mxu0 %v1875_v30  ;;  %1756 = vmatpush3.bf16.msra.mxu1 %v1876_v31  ;;  %v319_v30 = vsub.s32 7, %v2366_v38  ;;  %v1905_v31 = vld [vmem:[%s2532_s3 + $0x170] sm:$0xff]   ;;  %v1909_v38 = vld [vmem:[%s2532_s3 + $0x178] sm:$0xff]  }
  0x6b   : > { %1735 = vmatprep.subr.bf16.mxu0 %v1877_v32  ;;  %1757 = vmatprep.subr.bf16.mxu1 %v1878_v33  ;;  %v1906_v32 = vld [vmem:[%s2532_s3 + $0x1f0] sm:$0xff]   ;;  %v308_v33 = vrot.slane %v2372_v40, %v307_v25 }
  0x6e   : > { %1736 = vmatpush3.bf16.msra.mxu0 %v1879_v34  ;;  %1758 = vmatpush3.bf16.msra.mxu1 %v1880_v35  ;;  %v316_v34 = vrot.slane %v2372_v40, %v315_v27  ;;  %v312_v35 = vrot.slane %v2372_v40, %v311_v28 }
  0x6f   : > { %1765 = vmatprep.subr.bf16.mxu0 %v1881_v8  ;;  %1787 = vmatprep.subr.bf16.mxu1 %v1882_v36  ;;  %v1907_v8 = vld [vmem:[%s2532_s3 + $0x130] sm:$0xff]   ;;  %v320_v36 = vrot.slane %v2372_v40, %v319_v30 }
 0x104   : > { %v683_v48 = vpop.f32.mrb[0].mxu0  ;;  %v724_v50 = vpop.f32.mrb[0].mxu1 }
 0x105   : > { %v684_v49 = vadd.f32 %v683_v48, %v292_v44  ;;  %v685_v51 = vpop.f32.mrb[1].mxu0  ;;  %v725_v52 = vadd.f32 %v724_v50, %v300_v45  ;;  %v726_v54 = vpop.f32.mrb[1].mxu1  ;;  %v1911_v48 = vld [vmem:[%s2532_s3 + $0x138] sm:$0xff]  }
 0x106   : > { %v686_v53 = vadd.f32 %v685_v51, %v296_v46  ;;  %v687_v55 = vpop.f32.mrb[2].mxu0  ;;  %v727_v57 = vadd.f32 %v726_v54, %v304_v47  ;;  %v728_v58 = vpop.f32.mrb[2].mxu1 }
 0x107   : > { %v813_v56 = vmax.f32 %v684_v49, 0.0  ;;  %v688_v59 = vpop.f32.mrb[3].mxu0  ;;  %v815_v60 = vmax.f32 %v725_v52, 0.0  ;;  %v729_v62 = vpop.f32.mrb[3].mxu1 }
 0x108   : > { %v814_v61 = vmax.f32 %v686_v53, 0.0  ;;  %v816_v0 = vmax.f32 %v727_v57, 0.0  ;;  %v1912_v53 = vld [vmem:[%s2532_s3 + $0x1b8] sm:$0xff]  }
 0x109   : > { %v821_v63 = vpack.c.bf16 %v813_v56, %v813_v56  ;;  %v823_v1 = vpack.c.bf16 %v815_v60, %v815_v60 }
 0x10a   : > { %v822_v2 = vpack.c.bf16 %v814_v61, %v814_v61  ;;  %v824_v4 = vpack.c.bf16 %v816_v0, %v816_v0  ;;  %v1652_v0 = vld [vmem:[%s2533_s4] ss:$0 sm:$0xff] }
 0x10c   : > { %1380 = vmatprep.mubr.bf16.mxu0 %v822_v2  ;;  %1420 = vmatprep.mubr.bf16.mxu1 %v824_v4 }
 0x10d   : > { %1381 = vmatmul.mubr.bf16.vlgmr.msra.gmra.mrb[8].mxu0 %v821_v63  ;;  %1421 = vmatmul.mubr.bf16.vlgmr.msra.gmra.mrb[8].mxu1 %v823_v1 }
 0x10e   : > { %1766 = vmatpush3.bf16.msra.mxu0 %v1883_v3  ;;  %1788 = vmatpush3.bf16.msra.mxu1 %v1884_v5 }
 0x10f   : > { %1767 = vmatprep.subr.bf16.mxu0 %v1885_v6  ;;  %1789 = vmatprep.subr.bf16.mxu1 %v1886_v7 }
 0x112   : > { %1768 = vmatpush3.bf16.msra.mxu0 %v1887_v9  ;;  %1790 = vmatpush3.bf16.msra.mxu1 %v1888_v10 }
 0x113   : > { %1769 = vmatprep.subr.bf16.mxu0 %v1889_v11  ;;  %1791 = vmatprep.subr.bf16.mxu1 %v1890_v13 }
 0x116   : > { %1770 = vmatpush3.bf16.msra.mxu0 %v1891_v14  ;;  %1792 = vmatpush3.bf16.msra.mxu1 %v1892_v15 }
 0x117   : > { %1771 = vmatprep.subr.bf16.mxu0 %v1893_v16  ;;  %1793 = vmatprep.subr.bf16.mxu1 %v1894_v12 }
 0x11a   : > { %1772 = vmatpush3.bf16.msra.mxu0 %v1895_v17  ;;  %1794 = vmatpush3.bf16.msra.mxu1 %v1896_v18 }
 0x11b   : > { %1773 = vmatprep.subr.bf16.mxu0 %v1897_v19  ;;  %1795 = vmatprep.subr.bf16.mxu1 %v1898_v20 }
 0x11e   : > { %1774 = vmatpush3.bf16.msra.mxu0 %v1899_v21  ;;  %1796 = vmatpush3.bf16.msra.mxu1 %v1900_v22 }
 0x11f   : > { %1775 = vmatprep.subr.bf16.mxu0 %v1901_v23  ;;  %1797 = vmatprep.subr.bf16.mxu1 %v1902_v24 }
 0x122   : > { %1776 = vmatpush3.bf16.msra.mxu0 %v1903_v26  ;;  %1798 = vmatpush3.bf16.msra.mxu1 %v1904_v29 }
 0x123   : > { %1777 = vmatprep.subr.bf16.mxu0 %v1905_v31  ;;  %1799 = vmatprep.subr.bf16.mxu1 %v1906_v32 }
 0x124   : > { %v765_v39 = vpop.f32.mrb[4].mxu0  ;;  %v806_v43 = vpop.f32.mrb[4].mxu1 }
 0x125   : > { %v766_v42 = vadd.f32 %v765_v39, %v308_v33  ;;  %v767_v44 = vpop.f32.mrb[5].mxu0  ;;  %v807_v45 = vadd.f32 %v806_v43, %v316_v34  ;;  %v808_v46 = vpop.f32.mrb[5].mxu1 }
 0x126   : > { %v768_v40 = vadd.f32 %v767_v44, %v312_v35  ;;  %v769_v47 = vpop.f32.mrb[6].mxu0  ;;  %1778 = vmatpush3.bf16.msra.mxu0 %v1907_v8  ;;  %v809_v50 = vadd.f32 %v808_v46, %v320_v36  ;;  %v810_v51 = vpop.f32.mrb[6].mxu1  ;;  %1800 = vmatpush3.bf16.msra.mxu1 %v1908_v37 }
 0x127   : > { %v817_v49 = vmax.f32 %v766_v42, 0.0  ;;  %v770_v52 = vpop.f32.mrb[7].mxu0  ;;  %1779 = vmatprep.subr.bf16.mxu0 %v1909_v38  ;;  %v819_v54 = vmax.f32 %v807_v45, 0.0  ;;  %v811_v56 = vpop.f32.mrb[7].mxu1  ;;  %1801 = vmatprep.subr.bf16.mxu1 %v1910_v41 }
 0x128   : > { %v818_v55 = vmax.f32 %v768_v40, 0.0  ;;  %v820_v57 = vmax.f32 %v809_v50, 0.0 }
 0x129   : > { %v827_v58 = vpack.c.bf16 %v819_v54, %v819_v54  ;;  %v825_v60 = vpack.c.bf16 %v817_v49, %v817_v49 }
 0x12a   : > { %v826_v59 = vpack.c.bf16 %v818_v55, %v818_v55  ;;  %1780 = vmatpush3.bf16.msra.mxu0 %v1911_v48  ;;  %v828_v61 = vpack.c.bf16 %v820_v57, %v820_v57  ;;  %1802 = vmatpush3.bf16.msra.mxu1 %v1912_v53 }
 0x12c   : > { %1460 = vmatprep.mubr.bf16.mxu0 %v826_v59  ;;  %1500 = vmatprep.mubr.bf16.mxu1 %v828_v61 }
 0x12d   : > { %1461 = vmatmul.mubr.bf16.vlgmr.msra.gmra.mrb[12].mxu0 %v825_v60  ;;  %1501 = vmatmul.mubr.bf16.vlgmr.msra.gmra.mrb[12].mxu1 %v827_v58 }
 0x1e0   : > { %v1737_v62 = vpop.f32.mrb[8].mxu0  ;;  %v1759_v63 = vpop.f32.mrb[8].mxu1 }
 0x1e1   : > { %v1738_v1 = vpop.f32.mrb[9].mxu0  ;;  %v1760_v3 = vpop.f32.mrb[9].mxu1 }
 0x1e2   : > { %v1739_v2 = vadd.f32 %v1738_v1, %v1737_v62  ;;  %v1740_v4 = vpop.f32.mrb[10].mxu0  ;;  %v1761_v5 = vadd.f32 %v1760_v3, %v1759_v63  ;;  %v1762_v6 = vpop.f32.mrb[10].mxu1 }
 0x1e3   : > { %v1741_v7 = vpop.f32.mrb[11].mxu0  ;;  %v1763_v10 = vpop.f32.mrb[11].mxu1 }
 0x1e4   : > { %v1383_v9 = vadd.f32 %v1739_v2, %v1652_v0 }
 0x1e6   : > { %v1423_v11 = vadd.f32 %v1761_v5, %v1383_v9 }
 0x200   : > { %v1781_v13 = vpop.f32.mrb[12].mxu0  ;;  %v1803_v14 = vpop.f32.mrb[12].mxu1 }
 0x201   : > { %v1782_v15 = vpop.f32.mrb[13].mxu0  ;;  %v1804_v12 = vpop.f32.mrb[13].mxu1 }
 0x202   : > { %v1783_v16 = vadd.f32 %v1782_v15, %v1781_v13  ;;  %v1784_v17 = vpop.f32.mrb[14].mxu0  ;;  %v1805_v18 = vadd.f32 %v1804_v12, %v1803_v14  ;;  %v1806_v19 = vpop.f32.mrb[14].mxu1 }
 0x203   : > { %v1785_v20 = vpop.f32.mrb[15].mxu0  ;;  %v1807_v22 = vpop.f32.mrb[15].mxu1 }
 0x204   : > { %v1463_v21 = vadd.f32 %v1783_v16, %v1423_v11 }
 0x206   : > { %v1503_v23 = vadd.f32 %v1805_v18, %v1463_v21 }
 0x208   : > { %1508 = vst [vmem:[%s215_s17] sm:$0xff] %v1503_v23 }
 0x209   : > { %1926 = shalt.err (!%p1923_p3)
}
 0x20a   : > { %s1927_s10 = scalar_lea.hbm %s2487_s6, 128  ;;  %s1931_s13 = scalar_lea.hbm %s2534_s5, 256 }
 0x20b   : > { %p1928_p4 = scmp.ne.s32.totalorder %s2487_s6, %s1927_s10  ;;  %p1932_p9 = scmp.lt.u32.totalorder %s2487_s6, %s2534_s5 }
 0x20c   : > { %p1933_p10 = scmp.lt.u32.totalorder %s1931_s13, %s1927_s10  ;;  %p1935_p12 = scmp.lt.u32.totalorder %s1927_s10, %s2487_s6 }
 0x20d   : > { %p1929_p7 = pnand %p1928_p4, %p2047_p5 }
 0x20e   : > { %p1934_p11 = por %p1933_p10, %p1932_p9 }
 0x20f   : > { %p1930_p8 = pneg %p1929_p7 }
 0x210   : > { %p1936_p13 = por %p1935_p12, %p1934_p11 }
 0x212   : > { %p1937_p0 = pnand %p1936_p13, %p1930_p8 }
 0x214   : > { %1940 = shalt.err (!%p1937_p0)
}
 0x215   : > { %1809 = dma.vmem_to_hbm [thread:$0]  (%p2047_p5), %s2489_s23, 128, %s2487_s6, %s1510_s30  }
 0x216 PF: > { %p1815_p1 = scmp.ge.s32.totalorder %s1975_s21, 2  ;;  %s1535_s14 = sand.u32 1, %s1963_s18  }
 0x217   : > { %s1536_s17 = scalar_lea.sflag [#allocation3], %s1535_s14 }
 0x218   : > { %p1812_p2 = pnand %p1815_p1, %p2051_p6 }
 0x21a   : > { %1958 = dma.done.wait (!%p1812_p2), %s1536_s17, 128  }
 0x21b   : > { %1960 = vsyncadd (!%p1812_p2), %s1536_s17, 4294967168  ;;  %p15_p3 = scmp.ge.s32.totalorder %s2034_s24, 4   ;;  %s2537_s18 = smov %s1967_s19 }
 0x21c   : > { %s2538_s19 = smov %s1971_s20  ;;  %s2539_s20 = smov %s2045_s27 }
 0x21d   : > { %s2540_s21 = smov %s2034_s24  ;;  %17 = sbr.rel (!%p15_p3) target bundleno = 3 (0x3), region = 75 }
 0x224   :  { %1541 = vsyncpa [#allocation3], 1 }
 0x225   :  { %1543 = vsyncpa [#allocation3 + $0x1], 1 }

</bundles_post_ra>
